<compile_context>
chip_gen: v5e
topology: v5e:2x2
jax: 0.10.0
libtpu: 0.0.40
codegen_flags: <defaults>
</compile_context>

<pallas_src>
import jax
import jax.numpy as jnp
from jax.experimental import pallas as pl
from jax.experimental.pallas import tpu as pltpu

SMOOTH = 1.0
EPS = 1e-8

# TODO(synk): non-default module options (loss_mask, square=True, batch_dice=True,
# do_bg=False, gt already one-hot) are not implemented; this covers the default forward.


def _spatial_tile(hw: int, cap: int) -> int:
    """Largest multiple of 128 <= cap that divides hw; else the full extent."""
    if hw <= cap or hw % 128 != 0:
        return hw
    best = 128
    for t in range(128, cap + 1, 128):
        if hw % t == 0:
            best = t
    return best


def _soft_dice_kernel(x_ref, lab_ref, dc_ref, sxy_ref, sx_ref, sy_ref):
    """Grid = (batch, spatial_tiles).

    x_ref   : (1, C, T)  net-output tile (native dtype, cast to f32 here)
    lab_ref : (1, 1, T)  int32 label-map tile (one-hot is fused in-kernel)
    dc_ref  : (1, C, 1)  per-(b, c) dice coefficient (written on last spatial step)
    s*_ref  : (C, 1)     f32 accumulators for sum(x*y), sum(x), sum(y)
    """
    s = pl.program_id(1)

    @pl.when(s == 0)
    def _():
        sxy_ref[...] = jnp.zeros_like(sxy_ref)
        sx_ref[...] = jnp.zeros_like(sx_ref)
        sy_ref[...] = jnp.zeros_like(sy_ref)

    x = x_ref[0].astype(jnp.float32)            # (C, T) — f32 compute (v5e has no bf16 VPU)
    lab = lab_ref[0]                            # (1, T) int32
    C, T = x.shape

    # Fused one-hot: y[c, t] = (labels[t] == c)
    ch = jax.lax.broadcasted_iota(jnp.int32, (C, T), 0)
    y = (lab == ch).astype(jnp.float32)         # (C, T)

    # Algebraic simplification: fp + fn = sum(x) + sum(y) - 2*tp,
    # so only three lane-axis reductions are needed (no (1-x)/(1-y) temporaries).
    sxy_ref[...] += jnp.sum(x * y, axis=-1, keepdims=True)   # (C, 1)
    sx_ref[...] += jnp.sum(x, axis=-1, keepdims=True)        # (C, 1)
    sy_ref[...] += jnp.sum(y, axis=-1, keepdims=True)        # (C, 1)

    @pl.when(s == pl.num_programs(1) - 1)
    def _():
        tp = sxy_ref[...]                                    # (C, 1)
        nominator = 2.0 * tp + SMOOTH
        denominator = sx_ref[...] + sy_ref[...] + SMOOTH     # == 2*tp + fp + fn + smooth
        dc = nominator / (denominator + EPS)
        dc_ref[...] = dc.reshape(1, C, 1)


@jax.jit
def soft_dice_loss(x, labels):
    """SoftDiceLoss.forward (defaults): x (B,C,H,W) float, labels (B,H,W) int."""
    B, C, H, W = x.shape
    hw = H * W

    x_flat = x.reshape(B, C, hw)                      # lane-dense layout, native dtype
    lab_flat = labels.reshape(B, 1, hw).astype(jnp.int32)

    # Spatial tile: multiple of 128 lanes, ~<= 2 MiB of f32 activations per step.
    cap = max(128, ((2 << 20) // (4 * C)) // 128 * 128)
    T = _spatial_tile(hw, cap)
    grid = (B, hw // T)

    dc = pl.pallas_call(
        _soft_dice_kernel,
        out_shape=jax.ShapeDtypeStruct((B, C, 1), jnp.float32),
        grid_spec=pltpu.PrefetchScalarGridSpec(
            num_scalar_prefetch=0,
            grid=grid,
            in_specs=[
                pl.BlockSpec((1, C, T), lambda b, s: (b, 0, s)),
                pl.BlockSpec((1, 1, T), lambda b, s: (b, 0, s)),
            ],
            out_specs=pl.BlockSpec((1, C, 1), lambda b, s: (b, 0, 0)),
            scratch_shapes=[
                pltpu.VMEM((C, 1), jnp.float32),
                pltpu.VMEM((C, 1), jnp.float32),
                pltpu.VMEM((C, 1), jnp.float32),
            ],
        ),
        compiler_params=pltpu.CompilerParams(
            # batch axis writes disjoint output blocks -> shardable across cores;
            # spatial axis carries the scratch accumulators -> sequential.
            dimension_semantics=("parallel", "arbitrary"),
            vmem_limit_bytes=32 * 1024 * 1024,
        ),
    )(x_flat, lab_flat)

    # Final (B, C) mean + negation is negligible — do it in XLA.
    return -jnp.mean(dc[:, :, 0])


def soft_dice_loss_ref(x, labels):
    """Pure-JAX reference replicating SoftDiceLoss.forward semantics exactly."""
    C = x.shape[1]
    y_onehot = jnp.transpose(jax.nn.one_hot(labels, C, dtype=jnp.float32), (0, 3, 1, 2))
    x = x.astype(jnp.float32)
    tp = jnp.sum(x * y_onehot, axis=(2, 3))
    fp = jnp.sum(x * (1.0 - y_onehot), axis=(2, 3))
    fn = jnp.sum((1.0 - x) * y_onehot, axis=(2, 3))
    nominator = 2.0 * tp + SMOOTH
    denominator = 2.0 * tp + fp + fn + SMOOTH
    dc = nominator / (denominator + EPS)
    return -jnp.mean(dc)


if __name__ == "__main__":
    key = jax.random.PRNGKey(0)
    kx, ky = jax.random.split(key)

    B, C, H, W = 2, 4, 16, 16

    # Network output (probabilities; apply_nonlin=None so raw input).
    x = jax.random.uniform(kx, (B, C, H, W), dtype=jnp.float32)
    # Ground-truth label map (B, H, W); one-hot is built inside the kernel.
    labels = jax.random.randint(ky, (B, H, W), 0, C)

    loss = soft_dice_loss(x, labels)
    jax.block_until_ready(loss)

    ref = soft_dice_loss_ref(x, labels)
    assert jnp.allclose(loss, ref, atol=1e-5, rtol=1e-5), (loss, ref)

    print("KERNEL_OK")
</pallas_src>

<mosaic_0001>
module attributes {stable_mosaic.version = 11 : i64} {
  func.func @_soft_dice_kernel(%arg0: i32, %arg1: i32, %arg2: memref<1x4x256xf32, #tpu.memory_space<vmem>>, %arg3: memref<1x1x256xi32, #tpu.memory_space<vmem>>, %arg4: memref<1x4x1xf32, #tpu.memory_space<vmem>>, %arg5: memref<4x1xf32, #tpu.memory_space<vmem>>, %arg6: memref<4x1xf32, #tpu.memory_space<vmem>>, %arg7: memref<4x1xf32, #tpu.memory_space<vmem>>) attributes {dimension_semantics = [#tpu.dimension_semantics<parallel>, #tpu.dimension_semantics<arbitrary>], iteration_bounds = array<i64: 2, 1>, scalar_prefetch = 0 : i64, scratch_operands = 3 : i64, tpu.core_type = #tpu.core_type<tc>, window_params = [{transform_indices = @transform_0, window_bounds = array<i64: 1, 4, 256>}, {transform_indices = @transform_1, window_bounds = array<i64: 1, 1, 256>}, {transform_indices = @transform_2, window_bounds = array<i64: 1, 4, 1>}]} {
    %c0_i32 = arith.constant 0 : i32
    %0 = arith.cmpi eq, %arg1, %c0_i32 : i32
    %1 = arith.extui %0 : i1 to i32
    %c0_i32_0 = arith.constant 0 : i32
    %2 = arith.cmpi ne, %1, %c0_i32_0 : i32
    scf.if %2 {
      %cst_22 = arith.constant 0.000000e+00 : f32
      %31 = vector.broadcast %cst_22 : f32 to vector<4x1xf32>
      %c0_23 = arith.constant 0 : index
      %c0_24 = arith.constant 0 : index
      %32 = vector.load %arg5[%c0_23, %c0_24] : memref<4x1xf32, #tpu.memory_space<vmem>>, vector<4x1xf32>
      tpu.vector_store %arg5[%c0_23, %c0_24], %31 {strides = array<i32>} : memref<4x1xf32, #tpu.memory_space<vmem>>, vector<4x1xf32>,
      %cst_25 = arith.constant 0.000000e+00 : f32
      %33 = vector.broadcast %cst_25 : f32 to vector<4x1xf32>
      %c0_26 = arith.constant 0 : index
      %c0_27 = arith.constant 0 : index
      %34 = vector.load %arg6[%c0_26, %c0_27] : memref<4x1xf32, #tpu.memory_space<vmem>>, vector<4x1xf32>
      tpu.vector_store %arg6[%c0_26, %c0_27], %33 {strides = array<i32>} : memref<4x1xf32, #tpu.memory_space<vmem>>, vector<4x1xf32>,
      %cst_28 = arith.constant 0.000000e+00 : f32
      %35 = vector.broadcast %cst_28 : f32 to vector<4x1xf32>
      %c0_29 = arith.constant 0 : index
      %c0_30 = arith.constant 0 : index
      %36 = vector.load %arg7[%c0_29, %c0_30] : memref<4x1xf32, #tpu.memory_space<vmem>>, vector<4x1xf32>
      tpu.vector_store %arg7[%c0_29, %c0_30], %35 {strides = array<i32>} : memref<4x1xf32, #tpu.memory_space<vmem>>, vector<4x1xf32>,
    } else {
    }
    %c0 = arith.constant 0 : index
    %c0_1 = arith.constant 0 : index
    %c0_2 = arith.constant 0 : index
    %3 = vector.load %arg2[%c0, %c0_1, %c0_2] : memref<1x4x256xf32, #tpu.memory_space<vmem>>, vector<1x4x256xf32>
    %4 = vector.shape_cast %3 : vector<1x4x256xf32> to vector<4x256xf32>
    %c0_3 = arith.constant 0 : index
    %c0_4 = arith.constant 0 : index
    %c0_5 = arith.constant 0 : index
    %5 = vector.load %arg3[%c0_3, %c0_4, %c0_5] : memref<1x1x256xi32, #tpu.memory_space<vmem>>, vector<1x1x256xi32>
    %6 = vector.shape_cast %5 : vector<1x1x256xi32> to vector<1x256xi32>
    %7 = tpu.iota {dimensions = array<i32: 0>} : vector<4x256xi32>
    %8 = vector.broadcast %6 : vector<1x256xi32> to vector<4x256xi32>
    %9 = arith.cmpi eq, %8, %7 : vector<4x256xi32>
    %10 = arith.extui %9 : vector<4x256xi1> to vector<4x256xi32>
    %11 = arith.sitofp %10 : vector<4x256xi32> to vector<4x256xf32>
    %c0_6 = arith.constant 0 : index
    %c0_7 = arith.constant 0 : index
    %12 = vector.load %arg5[%c0_6, %c0_7] : memref<4x1xf32, #tpu.memory_space<vmem>>, vector<4x1xf32>
    %13 = arith.mulf %4, %11 : vector<4x256xf32>
    %cst = arith.constant dense<0.000000e+00> : vector<4xf32>
    %14 = vector.multi_reduction <add>, %13, %cst [1] : vector<4x256xf32> to vector<4xf32>
    %15 = vector.shape_cast %14 : vector<4xf32> to vector<4x1xf32>
    %16 = arith.addf %12, %15 : vector<4x1xf32>
    %c0_8 = arith.constant 0 : index
    %c0_9 = arith.constant 0 : index
    %17 = vector.load %arg5[%c0_8, %c0_9] : memref<4x1xf32, #tpu.memory_space<vmem>>, vector<4x1xf32>
    tpu.vector_store %arg5[%c0_8, %c0_9], %16 {strides = array<i32>} : memref<4x1xf32, #tpu.memory_space<vmem>>, vector<4x1xf32>,
    %c0_10 = arith.constant 0 : index
    %c0_11 = arith.constant 0 : index
    %18 = vector.load %arg6[%c0_10, %c0_11] : memref<4x1xf32, #tpu.memory_space<vmem>>, vector<4x1xf32>
    %cst_12 = arith.constant dense<0.000000e+00> : vector<4xf32>
    %19 = vector.multi_reduction <add>, %4, %cst_12 [1] : vector<4x256xf32> to vector<4xf32>
    %20 = vector.shape_cast %19 : vector<4xf32> to vector<4x1xf32>
    %21 = arith.addf %18, %20 : vector<4x1xf32>
    %c0_13 = arith.constant 0 : index
    %c0_14 = arith.constant 0 : index
    %22 = vector.load %arg6[%c0_13, %c0_14] : memref<4x1xf32, #tpu.memory_space<vmem>>, vector<4x1xf32>
    tpu.vector_store %arg6[%c0_13, %c0_14], %21 {strides = array<i32>} : memref<4x1xf32, #tpu.memory_space<vmem>>, vector<4x1xf32>,
    %c0_15 = arith.constant 0 : index
    %c0_16 = arith.constant 0 : index
    %23 = vector.load %arg7[%c0_15, %c0_16] : memref<4x1xf32, #tpu.memory_space<vmem>>, vector<4x1xf32>
    %cst_17 = arith.constant dense<0.000000e+00> : vector<4xf32>
    %24 = vector.multi_reduction <add>, %11, %cst_17 [1] : vector<4x256xf32> to vector<4xf32>
    %25 = vector.shape_cast %24 : vector<4xf32> to vector<4x1xf32>
    %26 = arith.addf %23, %25 : vector<4x1xf32>
    %c0_18 = arith.constant 0 : index
    %c0_19 = arith.constant 0 : index
    %27 = vector.load %arg7[%c0_18, %c0_19] : memref<4x1xf32, #tpu.memory_space<vmem>>, vector<4x1xf32>
    tpu.vector_store %arg7[%c0_18, %c0_19], %26 {strides = array<i32>} : memref<4x1xf32, #tpu.memory_space<vmem>>, vector<4x1xf32>,
    %c0_i32_20 = arith.constant 0 : i32
    %28 = arith.cmpi eq, %arg1, %c0_i32_20 : i32
    %29 = arith.extui %28 : i1 to i32
    %c0_i32_21 = arith.constant 0 : i32
    %30 = arith.cmpi ne, %29, %c0_i32_21 : i32
    scf.if %30 {
      %c0_22 = arith.constant 0 : index
      %c0_23 = arith.constant 0 : index
      %31 = vector.load %arg5[%c0_22, %c0_23] : memref<4x1xf32, #tpu.memory_space<vmem>>, vector<4x1xf32>
      %cst_24 = arith.constant 2.000000e+00 : f32
      %32 = vector.broadcast %cst_24 : f32 to vector<4x1xf32>
      %33 = arith.mulf %32, %31 : vector<4x1xf32>
      %cst_25 = arith.constant 1.000000e+00 : f32
      %34 = vector.broadcast %cst_25 : f32 to vector<4x1xf32>
      %35 = arith.addf %33, %34 : vector<4x1xf32>
      %c0_26 = arith.constant 0 : index
      %c0_27 = arith.constant 0 : index
      %36 = vector.load %arg6[%c0_26, %c0_27] : memref<4x1xf32, #tpu.memory_space<vmem>>, vector<4x1xf32>
      %c0_28 = arith.constant 0 : index
      %c0_29 = arith.constant 0 : index
      %37 = vector.load %arg7[%c0_28, %c0_29] : memref<4x1xf32, #tpu.memory_space<vmem>>, vector<4x1xf32>
      %38 = arith.addf %36, %37 : vector<4x1xf32>
      %cst_30 = arith.constant 1.000000e+00 : f32
      %39 = vector.broadcast %cst_30 : f32 to vector<4x1xf32>
      %40 = arith.addf %38, %39 : vector<4x1xf32>
      %cst_31 = arith.constant 9.99999993E-9 : f32
      %41 = vector.broadcast %cst_31 : f32 to vector<4x1xf32>
      %42 = arith.addf %40, %41 : vector<4x1xf32>
      %43 = arith.divf %35, %42 : vector<4x1xf32>
      %44 = vector.shape_cast %43 : vector<4x1xf32> to vector<1x4x1xf32>
      %c0_32 = arith.constant 0 : index
      %c0_33 = arith.constant 0 : index
      %c0_34 = arith.constant 0 : index
      %45 = vector.load %arg4[%c0_32, %c0_33, %c0_34] : memref<1x4x1xf32, #tpu.memory_space<vmem>>, vector<1x4x1xf32>
      tpu.vector_store %arg4[%c0_32, %c0_33, %c0_34], %44 {strides = array<i32>} : memref<1x4x1xf32, #tpu.memory_space<vmem>>, vector<1x4x1xf32>,
    } else {
    }
    return
  }
  func.func @transform_0(%arg0: i32, %arg1: i32) -> (i32, i32, i32) {
    %c0_i32 = arith.constant 0 : i32
    %c0_i32_0 = arith.constant 0 : i32
    return %arg0, %c0_i32, %arg1 : i32, i32, i32
  }
  func.func @transform_1(%arg0: i32, %arg1: i32) -> (i32, i32, i32) {
    %c0_i32 = arith.constant 0 : i32
    %c0_i32_0 = arith.constant 0 : i32
    return %arg0, %c0_i32, %arg1 : i32, i32, i32
  }
  func.func @transform_2(%arg0: i32, %arg1: i32) -> (i32, i32, i32) {
    %c0_i32 = arith.constant 0 : i32
    %c0_i32_0 = arith.constant 0 : i32
    %c0_i32_1 = arith.constant 0 : i32
    return %arg0, %c0_i32, %c0_i32_0 : i32, i32, i32
  }
}

</mosaic_0001>

<bundles_post_ra>
// kernel: soft_dice_loss.1
= control target key start
LH: loop header
LB: loop body
LE: loop exit
PB: predicated region body
PF: predicated region fallthrough
CT: control target
= control target key end

     0   :  { %s457_s9 = smov 0   ;;  %s459_s10 = smov 0   ;;  %s512_s0 = inlined_call_operand.vmem [shape: f32[2,4,256], index: 0, kind: input, shape index: {}]   ;;  %s513_s1 = inlined_call_operand.vmem [shape: s32[2,1,256], index: 1, kind: input, shape index: {}]   ;;  %s514_s2 = inlined_call_operand.vmem [shape: f32[2,4,1], index: 2, kind: output, shape index: {}]  }
   0x1   :  { %s461_s11 = smov 0  }
   0x2 LB: > { %s24_s12 = sadd.s32 1, %s435_s10  ;;  %p380_p0 = scmp.ge.s32.totalorder %s439_s11, 1  ;;  %s439_s11 = sphi %s461_s11, %s12_s11   ;;  %s435_s10 = sphi %s459_s10, %s516_s10   ;;  %s431_s9 = sphi %s457_s9, %s515_s9  }
   0x3   : > { %p26_p1 = scmp.ge.s32.totalorder %s24_s12, 2  ;;  %p147_p2 = scmp.lt.s32.totalorder %s439_s11, 3 }
   0x5   : > { %s518_s12 = smov (%p26_p1, %s24_s12), 0  ;;  %p148_p3 = pnand %p380_p0, %p147_p2 }
   0x6   : > { %p181_p4 = scmp.lt.s32.totalorder (!%p148_p3), %s431_s9, 1 }
   0x7   : > { %151 = sbr.rel (%p148_p3) target bundleno = 204 (0xcc), region = 28 }
   0xc   : > { %v213_v0 = vlaneseq  ;;  %s520_s9 = smov (!%p181_p4, %s431_s9), 1  ;;  %v441_v5 = vmov 0.0   ;;  %vm227_vm2 = vcmask 1043456   ;;  %vm207_vm3 = vcmask 3072  }
   0xd   : > { %s383_s13 = sshll.u32 %s520_s9, 1  ;;  %s389_s14 = sshll.u32 %s520_s9, 3  ;;  %209 = vst.msk [vmem:[#allocation3] sm:$0xf] %vm207_vm3, %v441_v5 }
   0xe   : > { %s197_s17 = scalar_lea.vmem %s513_s1, %s383_s13  ;;  %v214_v1 = vshrl.u32 %v213_v0, 7  ;;  %s188_s20 = scalar_lea.vmem %s512_s0, %s389_s14  ;;  %208 = vst.msk [vmem:[#allocation2] sm:$0xf] %vm207_vm3, %v441_v5 }
   0xf   : > { %v212_v2 = vld [vmem:[%s197_s17] sm:$0x3]  ;;  %210 = vst.msk [vmem:[#allocation4] sm:$0xf] %vm207_vm3, %v441_v5  ;;  %s384_s21 = sshll.u32 %s520_s9, 2 }
  0x10   : > { %v215_v3 = vperm.slane %v212_v2, 0  ;;  %v216_v4 = vperm.slane %v212_v2, 1  ;;  %v211_v8 = vld [vmem:[%s188_s20] sm:$0xff]  ;;  %s202_s24 = scalar_lea.vmem %s514_s2, %s384_s21 }
  0x12   : > { %vm217_vm0 = vcmp.eq.s32.totalorder %v215_v3, %v214_v1  ;;  %vm218_vm1 = vcmp.eq.s32.totalorder %v216_v4, %v214_v1 }
  0x13   : > { %v385_v6 = vsel %vm217_vm0, 1.0, %v441_v5  ;;  %v386_v7 = vsel %vm218_vm1, 1.0, %v441_v5 }
  0x14   : > { %v226_v9 = vrot.slane %v386_v7, 4  ;;  %v260_v22 = vsel %vm227_vm2, %v385_v6, 0.0  ;;  %v261_v23 = vsel %vm227_vm2, %v386_v7, 0.0  ;;  %v245_v28 = vld [vmem:[#allocation3] sm:$0xf] }
  0x15   : > { %v262_v24 = vadd.f32 %v261_v23, %v260_v22  ;;  %v223_v25 = vld [vmem:[#allocation2] sm:$0xf] }
  0x16   : > { %v228_v10 = vsel %vm227_vm2, %v385_v6, %v226_v9  ;;  %v259_v31 = vld [vmem:[#allocation4] sm:$0xf] }
  0x17   : > { %v230_v11 = vmul.f32 %v228_v10, %v211_v8 }
  0x19   : > { %232 = vst [vmem:[#allocation1] ss:$2 sm:$0xff] %v230_v11 }
  0x20   : > { %v233_v12 = vld.sshfl [vmem:[#allocation1] sm:$0xff pattern:$0x75316420]  ;;  %v234_v13 = vld.sshfl [vmem:[#allocation1 + $0x8] sm:$0xff pattern:$0x75316420] }
  0x21   : > { %247 = vst [vmem:[#allocation1] ss:$2 sm:$0xff] %v211_v8  ;;  %v237_v14 = vsel %vm227_vm2, %v233_v12, 0.0  ;;  %v238_v15 = vsel %vm227_vm2, %v234_v13, 0.0 }
  0x22   : > { %v239_v16 = vadd.f32 %v238_v15, %v237_v14 }
  0x24   : > { %240 = vadd.xlane.f32.xlu1 %v239_v16 }
  0x28   : > { %v248_v17 = vld.sshfl [vmem:[#allocation1] sm:$0xff pattern:$0x75316420]  ;;  %v249_v18 = vld.sshfl [vmem:[#allocation1 + $0x8] sm:$0xff pattern:$0x75316420] }
  0x29   : > { %v252_v19 = vsel %vm227_vm2, %v248_v17, 0.0  ;;  %v253_v20 = vsel %vm227_vm2, %v249_v18, 0.0 }
  0x2a   : > { %v254_v21 = vadd.f32 %v253_v20, %v252_v19 }
  0x2c   : > { %255 = vadd.xlane.f32.xlu0 %v254_v21 }
  0x34   : > { %263 = vadd.xlane.f32.xlu0 %v262_v24 }
  0x97   : > { %v241_v26 = vpop.xlane.xlu1 %240 }
  0x98   : > { %v242_v27 = vadd.f32 %v241_v26, %v223_v25 }
  0x9a   : > { %244 = vst.msk [vmem:[#allocation2] sm:$0xf] %vm207_vm3, %v242_v27 }
  0x9f   : > { %v256_v29 = vpop.xlane.xlu0 %255 }
  0xa0   : > { %v257_v30 = vadd.f32 %v256_v29, %v245_v28 }
  0xa1   : > { %v270_v40 = vld [vmem:[#allocation2] sm:$0xf] }
  0xa2   : > { %258 = vst.msk [vmem:[#allocation3] sm:$0xf] %vm207_vm3, %v257_v30  ;;  %v271_v43 = vmul.f32 2.0, %v270_v40 }
  0xa4   : > { %v272_v48 = vadd.f32 1.0, %v271_v43 }
  0xa7   : > { %v264_v32 = vpop.xlane.xlu0 %263 }
  0xa8   : > { %v265_v33 = vadd.f32 %v264_v32, %v259_v31 }
  0xa9   : > { %v273_v34 = vld [vmem:[#allocation3] sm:$0xf] }
  0xaa   : > { %266 = vst.msk [vmem:[#allocation4] sm:$0xf] %vm207_vm3, %v265_v33 }
  0xb1   : > { %v274_v35 = vld [vmem:[#allocation4] sm:$0xf] }
  0xb2   : > { %v275_v36 = vadd.f32 %v274_v35, %v273_v34 }
  0xb4   : > { %v276_v37 = vadd.f32 1.0, %v275_v36 }
  0xb6   : > { %v277_v38 = vadd.f32 1e-08, %v276_v37 }
  0xb8   : > { %415 = vrcp.f32 %v277_v38  ;;  %v289_v44 = vand.u32 2147483648, %v277_v38  ;;  %v287_v46 = vand.u32 2147483647, %v277_v38  ;;  %vm283_vm5 = vweird.f32 %v277_v38 }
  0xba   : > { %v290_v49 = vor.u32 1.1754944e-38, %v289_v44  ;;  %vm288_vm7 = vcmp.eq.f32.partialorder %v287_v46, 8.507059e+37 }
  0xbe   : > { %v416_v39 = vpop.eup %415 }
  0xbf   : > { %v279_v41 = vmul.f32 %v416_v39, %v277_v38  ;;  %vm284_vm4 = vweird.f32 %v416_v39 }
  0xc0   : > { %vm285_vm6 = vmor %vm283_vm5, %vm284_vm4 }
  0xc1   : > { %v280_v42 = vsub.f32 1.0, %v279_v41 }
  0xc3   : > { %v281_v45 = vmul.f32 %v416_v39, %v280_v42 }
  0xc5   : > { %v282_v47 = vadd.f32 %v416_v39, %v281_v45 }
  0xc7   : > { %v286_v50 = vsel %vm285_vm6, %v416_v39, %v282_v47 }
  0xc8   : > { %v291_v51 = vsel %vm288_vm7, %v290_v49, %v286_v50 }
  0xc9   : > { %v292_v52 = vmul.f32 %v291_v51, %v272_v48 }
  0xcb   : > { %293 = vst.msk [vmem:[%s202_s24] sm:$0xf] %vm207_vm3, %v292_v52 }
  0xcc PF: > { %s12_s11 = sadd.s32 1, %s439_s11   ;;  %s515_s9 = smov %s435_s10 }
  0xcd   : > { %p9_p5 = scmp.ge.s32.totalorder %s12_s11, 4   ;;  %s516_s10 = smov %s518_s12 }
  0xcf   :  { %11 = sbr.rel (!%p9_p5) target bundleno = 2 (0x2), region = 69 }

</bundles_post_ra>
